<compile_context>
chip_gen: v5e
topology: v5e:2x2
jax: 0.10.0
libtpu: 0.0.40
codegen_flags: <defaults>
</compile_context>

<pallas_src>
import jax
import jax.numpy as jnp
from jax.experimental import pallas as pl
from jax.experimental.pallas import tpu as pltpu

LANE = 128      # TPU lane width (last-dim tile)
SUBLANE = 8     # f32/bf16 sublane alignment for the batch (second-last) dim
MAX_TM = 1024   # rows per grid step for huge batches (amortizes ~0.35 us/step)


def _round_up(x, m):
    return (x + m - 1) // m * m


def mlp_kernel(x_ref, w1_ref, b1_ref, w2_ref, b2_ref, o_ref):
    """One (TM, n_features) row-tile of x; weights/biases are VMEM-resident
    (constant index_maps) across the whole grid.

    x_ref : (TM, F)        compute dtype (bf16 or f32)
    w1_ref: (F, H_pad)     compute dtype
    b1_ref: (1, H_pad)     f32
    w2_ref: (H_pad, A_pad) compute dtype
    b2_ref: (1, A_pad)     f32
    o_ref : (TM, n_actions) f32   (lane-sliced before the store)
    """
    # fc1: MXU matmul with f32 accumulation, bias + ReLU in f32.
    h = jnp.dot(x_ref[...], w1_ref[...], preferred_element_type=jnp.float32)
    h = jnp.maximum(h + b1_ref[...], 0.0)
    # out layer: cast activations to the MXU dtype, accumulate in f32.
    acc = jnp.dot(h.astype(w2_ref.dtype), w2_ref[...],
                  preferred_element_type=jnp.float32)
    acc = acc + b2_ref[...]
    # Shrink the lane-dense (TM, A_pad) result to the real action count before
    # the store: ~32x less write DMA, masked vst is cheap on an idle store slot.
    o_ref[...] = acc[:, : o_ref.shape[-1]].astype(o_ref.dtype)


def prepare_params(w1, b1, w2, b2, compute_dtype=jnp.bfloat16):
    """One-time parameter prep (do NOT call per forward step).

    w1: (hidden, n_features), b1: (hidden,) or (1, hidden)   -- PyTorch (out, in)
    w2: (n_actions, hidden),  b2: (n_actions,) or (1, n_actions)

    Returns (w1_p, b1_p, w2_p, b2_p) with weights transposed to (in, out),
    hidden/action axes zero-padded to 128 lanes, matmul operands cast to
    `compute_dtype`, biases kept in f32.
    """
    hidden, n_features = w1.shape
    n_actions = w2.shape[0]
    H_pad = _round_up(hidden, LANE)
    A_pad = _round_up(n_actions, LANE)

    w1_p = (jnp.zeros((n_features, H_pad), compute_dtype)
            .at[:, :hidden].set(w1.T.astype(compute_dtype)))
    b1_p = (jnp.zeros((1, H_pad), jnp.float32)
            .at[:, :hidden].set(jnp.asarray(b1, jnp.float32).reshape(1, -1)))
    w2_p = (jnp.zeros((H_pad, A_pad), compute_dtype)
            .at[:hidden, :n_actions].set(w2.T.astype(compute_dtype)))
    b2_p = (jnp.zeros((1, A_pad), jnp.float32)
            .at[:, :n_actions].set(jnp.asarray(b2, jnp.float32).reshape(1, -1)))
    return w1_p, b1_p, w2_p, b2_p


def net_forward(x, w1_p, b1_p, w2_p, b2_p, *, n_actions):
    """Forward pass with pre-prepared (padded/cast) parameters.

    x: (B, n_features) f32  ->  (B, n_actions) f32
    """
    B, n_features = x.shape
    assert w1_p.shape[0] == n_features, "prepared W1 does not match x features"
    compute_dtype = w1_p.dtype
    H_pad = w1_p.shape[1]
    A_pad = w2_p.shape[1]

    # Batch tiling (all static Python on shapes):
    #  - small batches: a single sublane-aligned tile (per-env-step path),
    #  - mid-size batches: two roughly-even tiles so v7x's 2 TCs both get work,
    #  - huge batches: MAX_TM-row tiles.
    if B <= 256:
        TM = _round_up(B, SUBLANE)
    elif B <= 2 * MAX_TM:
        TM = _round_up(pl.cdiv(B, 2), SUBLANE)
    else:
        TM = MAX_TM
    B_pad = _round_up(B, TM)

    x_c = x.astype(compute_dtype)          # halves x DMA bytes on the bf16 path
    if B_pad != B:
        x_c = jnp.pad(x_c, ((0, B_pad - B), (0, 0)))  # tiny: (B_pad, n_features)

    out = pl.pallas_call(
        mlp_kernel,
        out_shape=jax.ShapeDtypeStruct((B_pad, n_actions), jnp.float32),
        grid=(B_pad // TM,),
        in_specs=[
            # x: batch-tiled; minor dim = full array dim (no HBM feature padding).
            pl.BlockSpec((TM, n_features), lambda i: (i, 0)),
            pl.BlockSpec((n_features, H_pad), lambda i: (0, 0)),  # W1 resident
            pl.BlockSpec((1, H_pad), lambda i: (0, 0)),           # b1 resident
            pl.BlockSpec((H_pad, A_pad), lambda i: (0, 0)),       # W2 resident
            pl.BlockSpec((1, A_pad), lambda i: (0, 0)),           # b2 resident
        ],
        # output: batch-tiled, minor dim = real n_actions (no HBM action padding).
        out_specs=pl.BlockSpec((TM, n_actions), lambda i: (i, 0)),
        compiler_params=pltpu.CompilerParams(
            dimension_semantics=("parallel",),   # v7x: shard batch tiles over 2 TCs
        ),
    )(x_c, w1_p, b1_p, w2_p, b2_p)

    return out[:B] if B_pad != B else out


def init_params(key, n_features, n_actions, hidden=10):
    """Synthetic init mirroring the PyTorch module:
       weights ~ N(0, 0.1); biases ~ U(-1/sqrt(fan_in), 1/sqrt(fan_in))."""
    k1, k2, k3, k4 = jax.random.split(key, 4)
    w1 = 0.1 * jax.random.normal(k1, (hidden, n_features), jnp.float32)   # (out, in)
    w2 = 0.1 * jax.random.normal(k2, (n_actions, hidden), jnp.float32)    # (out, in)
    bnd1 = 1.0 / float(n_features) ** 0.5
    bnd2 = 1.0 / float(hidden) ** 0.5
    b1 = jax.random.uniform(k3, (1, hidden), jnp.float32, -bnd1, bnd1)
    b2 = jax.random.uniform(k4, (1, n_actions), jnp.float32, -bnd2, bnd2)
    return w1, b1, w2, b2


if __name__ == "__main__":
    key = jax.random.PRNGKey(0)
    n_features, n_actions, batch = 4, 4, 8

    kx, kp, kx2 = jax.random.split(key, 3)
    x = jax.random.normal(kx, (batch, n_features), jnp.float32)
    w1, b1, w2, b2 = init_params(kp, n_features, n_actions)

    def ref_fn(xv):
        return jnp.maximum(xv @ w1.T + b1, 0.0) @ w2.T + b2

    fwd = jax.jit(net_forward, static_argnames=("n_actions",))

    # --- f32 MXU path: tight check on the small DQN-style batch ---
    p_f32 = prepare_params(w1, b1, w2, b2, compute_dtype=jnp.float32)
    out32 = jax.block_until_ready(fwd(x, *p_f32, n_actions=n_actions))
    assert out32.shape == (batch, n_actions)
    assert jnp.allclose(out32, ref_fn(x), atol=1e-5, rtol=1e-5)

    # --- default bf16 MXU path (f32 accumulation): loose check ---
    p_bf16 = prepare_params(w1, b1, w2, b2)  # prepared once, reused every call
    out_bf = jax.block_until_ready(fwd(x, *p_bf16, n_actions=n_actions))
    assert out_bf.shape == (batch, n_actions)
    assert jnp.allclose(out_bf, ref_fn(x), atol=1e-2, rtol=2e-2)

    # --- large ragged batch: exercises the 2-tile batch grid + pad/slice path ---
    big_b = 1037
    xb = jax.random.normal(kx2, (big_b, n_features), jnp.float32)
    outb = jax.block_until_ready(fwd(xb, *p_bf16, n_actions=n_actions))
    assert outb.shape == (big_b, n_actions)
    assert jnp.allclose(outb, ref_fn(xb), atol=1e-2, rtol=2e-2)

    print("KERNEL_OK")
</pallas_src>

<mosaic_0001>
module attributes {stable_mosaic.version = 11 : i64} {
  func.func @mlp_kernel(%arg0: i32, %arg1: memref<8x4xf32, #tpu.memory_space<vmem>>, %arg2: memref<4x128xf32, #tpu.memory_space<vmem>>, %arg3: memref<1x128xf32, #tpu.memory_space<vmem>>, %arg4: memref<128x128xf32, #tpu.memory_space<vmem>>, %arg5: memref<1x128xf32, #tpu.memory_space<vmem>>, %arg6: memref<8x4xf32, #tpu.memory_space<vmem>>) attributes {dimension_semantics = [#tpu.dimension_semantics<parallel>], iteration_bounds = array<i64: 1>, scalar_prefetch = 0 : i64, scratch_operands = 0 : i64, tpu.core_type = #tpu.core_type<tc>, window_params = [{transform_indices = @transform_0, window_bounds = array<i64: 8, 4>}, {pipeline_mode = #tpu.pipeline_mode<synchronous>, transform_indices = @transform_1, window_bounds = array<i64: 4, 128>}, {pipeline_mode = #tpu.pipeline_mode<synchronous>, transform_indices = @transform_2, window_bounds = array<i64: 1, 128>}, {pipeline_mode = #tpu.pipeline_mode<synchronous>, transform_indices = @transform_3, window_bounds = array<i64: 128, 128>}, {pipeline_mode = #tpu.pipeline_mode<synchronous>, transform_indices = @transform_4, window_bounds = array<i64: 1, 128>}, {transform_indices = @transform_5, window_bounds = array<i64: 8, 4>}]} {
    %c0 = arith.constant 0 : index
    %c0_0 = arith.constant 0 : index
    %0 = vector.load %arg1[%c0, %c0_0] : memref<8x4xf32, #tpu.memory_space<vmem>>, vector<8x4xf32>
    %c0_1 = arith.constant 0 : index
    %c0_2 = arith.constant 0 : index
    %1 = vector.load %arg2[%c0_1, %c0_2] : memref<4x128xf32, #tpu.memory_space<vmem>>, vector<4x128xf32>
    %cst = arith.constant dense<0.000000e+00> : vector<8x128xf32>
    %2 = tpu.matmul %0, %1, %cst {dimension_numbers = #tpu.dot_dimension_numbers<[1], [0], [0], [1], [0, 0, 1, 1], [], []>} : vector<8x4xf32>, vector<4x128xf32>, vector<8x128xf32> -> vector<8x128xf32>
    %c0_3 = arith.constant 0 : index
    %c0_4 = arith.constant 0 : index
    %3 = vector.load %arg3[%c0_3, %c0_4] : memref<1x128xf32, #tpu.memory_space<vmem>>, vector<1x128xf32>
    %4 = vector.broadcast %3 : vector<1x128xf32> to vector<8x128xf32>
    %5 = arith.addf %2, %4 : vector<8x128xf32>
    %cst_5 = arith.constant 0.000000e+00 : f32
    %6 = vector.broadcast %cst_5 : f32 to vector<8x128xf32>
    %7 = arith.maximumf %5, %6 : vector<8x128xf32>
    %c0_6 = arith.constant 0 : index
    %c0_7 = arith.constant 0 : index
    %8 = vector.load %arg4[%c0_6, %c0_7] : memref<128x128xf32, #tpu.memory_space<vmem>>, vector<128x128xf32>
    %cst_8 = arith.constant dense<0.000000e+00> : vector<8x128xf32>
    %9 = tpu.matmul %7, %8, %cst_8 {dimension_numbers = #tpu.dot_dimension_numbers<[1], [0], [0], [1], [0, 0, 1, 1], [], []>} : vector<8x128xf32>, vector<128x128xf32>, vector<8x128xf32> -> vector<8x128xf32>
    %c0_9 = arith.constant 0 : index
    %c0_10 = arith.constant 0 : index
    %10 = vector.load %arg5[%c0_9, %c0_10] : memref<1x128xf32, #tpu.memory_space<vmem>>, vector<1x128xf32>
    %11 = vector.broadcast %10 : vector<1x128xf32> to vector<8x128xf32>
    %12 = arith.addf %9, %11 : vector<8x128xf32>
    %13 = vector.extract_strided_slice %12 {offsets = [0, 0], sizes = [8, 4], strides = [1, 1]} : vector<8x128xf32> to vector<8x4xf32>
    %c0_11 = arith.constant 0 : index
    %c0_12 = arith.constant 0 : index
    %14 = vector.load %arg6[%c0_11, %c0_12] : memref<8x4xf32, #tpu.memory_space<vmem>>, vector<8x4xf32>
    tpu.vector_store %arg6[%c0_11, %c0_12], %13 {strides = array<i32>} : memref<8x4xf32, #tpu.memory_space<vmem>>, vector<8x4xf32>,
    return
  }
  func.func @transform_0(%arg0: i32) -> (i32, i32) {
    %c0_i32 = arith.constant 0 : i32
    %c0_i32_0 = arith.constant 0 : i32
    return %arg0, %c0_i32 : i32, i32
  }
  func.func @transform_1(%arg0: i32) -> (i32, i32) {
    %c0_i32 = arith.constant 0 : i32
    %c0_i32_0 = arith.constant 0 : i32
    %c0_i32_1 = arith.constant 0 : i32
    return %c0_i32, %c0_i32_0 : i32, i32
  }
  func.func @transform_2(%arg0: i32) -> (i32, i32) {
    %c0_i32 = arith.constant 0 : i32
    %c0_i32_0 = arith.constant 0 : i32
    %c0_i32_1 = arith.constant 0 : i32
    return %c0_i32, %c0_i32_0 : i32, i32
  }
  func.func @transform_3(%arg0: i32) -> (i32, i32) {
    %c0_i32 = arith.constant 0 : i32
    %c0_i32_0 = arith.constant 0 : i32
    %c0_i32_1 = arith.constant 0 : i32
    return %c0_i32, %c0_i32_0 : i32, i32
  }
  func.func @transform_4(%arg0: i32) -> (i32, i32) {
    %c0_i32 = arith.constant 0 : i32
    %c0_i32_0 = arith.constant 0 : i32
    %c0_i32_1 = arith.constant 0 : i32
    return %c0_i32, %c0_i32_0 : i32, i32
  }
  func.func @transform_5(%arg0: i32) -> (i32, i32) {
    %c0_i32 = arith.constant 0 : i32
    %c0_i32_0 = arith.constant 0 : i32
    return %arg0, %c0_i32 : i32, i32
  }
}

</mosaic_0001>

<bundles_post_ra>
// kernel: net_forward.1
= control target key start
LH: loop header
LB: loop body
LE: loop exit
PB: predicated region body
PF: predicated region fallthrough
CT: control target
= control target key end

     0   :  { %10 = vsyncpa [#allocation3], 0  ;;  %s150_s21 = smov [#allocation2]   ;;  %s151_s23 = smov 128   ;;  %s203_s0 = inlined_call_operand.vmem [shape: f32[8,4], index: 0, kind: input, shape index: {}]   ;;  %s204_s1 = inlined_call_operand.vmem [shape: f32[4,128], index: 1, kind: input, shape index: {}]   ;;  %s205_s2 = inlined_call_operand.vmem [shape: f32[1,128], index: 2, kind: input, shape index: {}]   ;;  %s206_s3 = inlined_call_operand.hbm [shape: f32[128,128], index: 3, kind: input, shape index: {}]   ;;  %s207_s4 = inlined_call_operand.vmem [shape: f32[1,128], index: 4, kind: input, shape index: {}]   ;;  %s208_s5 = inlined_call_operand.vmem [shape: f32[8,4], index: 5, kind: output, shape index: {}]  }
   0x1   :  { %s21_s20 = sshll.u32 %s206_s3, 4  ;;  %s23_s22 = sshll.u32 %s150_s21, 4  ;;  %s22_s20 = int_to_ptr.hbm [resolvable:$true] %s21_s20  ;;  %s24_s22 = int_to_ptr.vmem [resolvable:$true] %s23_s22 }
   0x2   :  { %s152_s24 = smov 8  }
   0x3   :  { %29 = dma.hbm_to_vmem [thread:$0]  %s22_s20, 2048, %s24_s22, [#allocation3], %s151_s23, %s151_s23, %s152_s24  }
   0x4   :  { %148 = dma.done.wait [#allocation3], 2048  }
   0x5   :  { %149 = vsyncadd [#allocation3], 4294965248  ;;  %vm46_vm0 = vcmask 1043456   ;;  %vm42_vm1 = vcmask 31744   ;;  %v37_v0 = vld [vmem:[%s204_s1] sm:$0xf] }
   0x6   :  { %v36_v1 = vld [vmem:[%s203_s0] sm:$0xff]  ;;  %v86_v2 = vld [vmem:[#allocation2 + $0x78] sm:$0xff]  ;;  %117 = vmatpush.msk.msra.mxu0 %vm46_vm0, %v37_v0  ;;  %v85_v3 = vld [vmem:[#allocation2 + $0x70] sm:$0xff] }
   0x7   :  { %91 = vmatpush.msra.mxu1 %v86_v2  ;;  %118 = vmatmul.msk.f32.vlgmr.msra.gmra.mxu0 %vm42_vm1, %v36_v1  ;;  %v84_v4 = vld [vmem:[#allocation2 + $0x68] sm:$0xff]  ;;  %v83_v5 = vld [vmem:[#allocation2 + $0x60] sm:$0xff]  ;;  %v82_v6 = vld [vmem:[#allocation2 + $0x58] sm:$0xff] }
   0x8   :  { %v81_v7 = vld [vmem:[#allocation2 + $0x50] sm:$0xff]  ;;  %v80_v8 = vld [vmem:[#allocation2 + $0x48] sm:$0xff]  ;;  %v79_v9 = vld [vmem:[#allocation2 + $0x40] sm:$0xff] }
   0x9   :  { %92 = vmatpush.msra.mxu1 %v85_v3  ;;  %v78_v10 = vld [vmem:[#allocation2 + $0x38] sm:$0xff]  ;;  %v77_v11 = vld [vmem:[#allocation2 + $0x30] sm:$0xff]  ;;  %v76_v12 = vld [vmem:[#allocation2 + $0x28] sm:$0xff] }
   0xa   :  { %v75_v13 = vld [vmem:[#allocation2 + $0x20] sm:$0xff]  ;;  %v74_v14 = vld [vmem:[#allocation2 + $0x18] sm:$0xff]  ;;  %v73_v15 = vld [vmem:[#allocation2 + $0x10] sm:$0xff] }
   0xb   :  { %93 = vmatpush.msra.mxu1 %v84_v4  ;;  %v72_v16 = vld [vmem:[#allocation2 + $0x8] sm:$0xff]  ;;  %v71_v17 = vld [vmem:[#allocation2] sm:$0xff] }
   0xc   :  { %v122_v18 = vld [vmem:[%s205_s2] ss:$0 sm:$0xff] }
   0xd   :  { %94 = vmatpush.msra.mxu1 %v83_v5  ;;  %v123_v22 = vld [vmem:[%s207_s4] ss:$0 sm:$0xff] }
   0xf   :  { %95 = vmatpush.msra.mxu1 %v82_v6 }
  0x11   :  { %96 = vmatpush.msra.mxu1 %v81_v7 }
  0x13   :  { %97 = vmatpush.msra.mxu1 %v80_v8 }
  0x15   :  { %98 = vmatpush.msra.mxu1 %v79_v9 }
  0x17   :  { %99 = vmatpush.msra.mxu1 %v78_v10 }
  0x19   :  { %100 = vmatpush.msra.mxu1 %v77_v11 }
  0x1b   :  { %101 = vmatpush.msra.mxu1 %v76_v12 }
  0x1d   :  { %102 = vmatpush.msra.mxu1 %v75_v13 }
  0x1f   :  { %103 = vmatpush.msra.mxu1 %v74_v14 }
  0x21   :  { %104 = vmatpush.msra.mxu1 %v73_v15 }
  0x23   :  { %105 = vmatpush.msra.mxu1 %v72_v16 }
  0x25   :  { %106 = vmatpush.msra.mxu1 %v71_v17 }
  0x84   :  { %v67_v19 = vpop.f32.mrf.mxu0 }
  0x85   :  { %v68_v20 = vadd.f32 %v122_v18, %v67_v19 }
  0x87   :  { %v70_v21 = vmax.f32 %v68_v20, 0.0 }
  0x89   :  { %107 = vmatmul.f32.vlgmr.msra.gmra.mxu1 %v70_v21 }
 0x106   :  { %v108_v23 = vpop.f32.mrf.mxu1 }
 0x107   :  { %v109_v24 = vadd.f32 %v123_v22, %v108_v23 }
 0x109   :  { %111 = vst.msk [vmem:[%s208_s5] sm:$0xff] %vm42_vm1, %v109_v24 }
 0x10a   :  { %116 = vsyncpa [#allocation3], 1 }

</bundles_post_ra>
